<compile_context>
chip_gen: v7x
topology: tpu7x:2x2x1
jax: 0.10.0
libtpu: 0.0.40
codegen_flags: <defaults>
</compile_context>

<pallas_src>
import functools
import math

import jax
import jax.numpy as jnp
from jax.experimental import pallas as pl
from jax.experimental.pallas import tpu as pltpu


def _iou_kernel(pred_ref, target_ref, and_out, sum_out, and_acc, sum_acc,
                *, d_row, dc, needs_mask):
    """Accumulate per-row sum(t*p) and sum(t+p) over D chunks."""
    j = pl.program_id(1)
    last = pl.num_programs(1) - 1

    @pl.when(j == 0)
    def _():
        and_acc[...] = jnp.zeros_like(and_acc)
        sum_acc[...] = jnp.zeros_like(sum_acc)

    def accumulate(masked):
        p = pred_ref[...].astype(jnp.float32)
        t = target_ref[...].astype(jnp.float32)
        if masked:
            # Ragged final chunk: zero lanes past the true row length.
            # Pallas does not zero-fill partial blocks, so this is required.
            col = jax.lax.broadcasted_iota(jnp.int32, p.shape, 1)
            valid = (j * dc + col) < d_row
            p = jnp.where(valid, p, 0.0)
            t = jnp.where(valid, t, 0.0)
        # Two fused per-row reductions:
        #   iand = sum(t * p),  ior = sum(t) + sum(p) - iand = sum(t + p) - iand
        and_acc[...] += jnp.sum(t * p, axis=-1, keepdims=True)
        sum_acc[...] += jnp.sum(t + p, axis=-1, keepdims=True)

    if needs_mask:
        # Mask only on the final (ragged) chunk; every other chunk runs the
        # cheap unmasked path so the kernel stays HBM-bound on v7x.
        @pl.when(j < last)
        def _():
            accumulate(False)

        @pl.when(j == last)
        def _():
            accumulate(True)
    else:
        accumulate(False)

    @pl.when(j == last)
    def _():
        and_out[...] = and_acc[...]
        sum_out[...] = sum_acc[...]


def iou_loss(pred, target, size_average=True, *, tile_target_bytes=4 << 20):
    """Pallas implementation of _iou(pred, target, size_average)."""
    assert pred.shape == target.shape
    n = pred.shape[0]
    d = math.prod(pred.shape[1:])

    itemsize = jnp.dtype(pred.dtype).itemsize
    # Sublane multiple for dense vreg packing (8 for 32-bit, 16 bf16, 32 int8).
    sub = 8 if itemsize >= 4 else (16 if itemsize == 2 else 32)

    # --- sublane-dense fold for small batches ------------------------------
    # With n < 8 a (n, dc) tile wastes most sublanes of every vreg; fold part
    # of the feature axis into the sublane axis (metadata-only reshape) and
    # re-combine the `fold` per-row partials per sample in the wrapper.
    fold = 1
    if n < sub:
        chosen = None
        for f in (8, 4, 2):
            if d % f == 0 and (n * f) % sub == 0 and d // f >= 128:
                chosen = f
                break
        if chosen is None:
            for f in (8, 4, 2):
                if d % f == 0 and d // f >= 128:
                    chosen = f
                    break
        if chosen is not None:
            fold = chosen
    rows = n * fold
    d_row = d // fold

    # Metadata-only reshape: `fold` consecutive rows per sample, no pad copy.
    pred2 = pred.reshape(rows, d_row)
    target2 = target.reshape(rows, d_row)

    # --- lane (D) chunk -----------------------------------------------------
    # Prefer a 128-multiple chunk that exactly divides d_row (mask never
    # emitted); only fall back to a masked ragged last chunk otherwise.
    max_dc = max(128, (tile_target_bytes // (sub * itemsize)) // 128 * 128)
    if d_row <= max_dc:
        dc = d_row
    else:
        dc = 0
        cand = max_dc
        min_ok = max(128, max_dc // 2)
        while cand >= min_ok:
            if d_row % cand == 0:
                dc = cand
                break
            cand -= 128
        if dc == 0:
            dc = max_dc
    num_dc = pl.cdiv(d_row, dc)
    needs_mask = (num_dc * dc != d_row)

    # --- sublane (batch) block ----------------------------------------------
    if rows <= sub:
        nb = rows
    else:
        bytes_per_row = max(dc * itemsize, 1)
        target_rows = max(sub, tile_target_bytes // bytes_per_row)
        nb = min((rows // sub) * sub, (target_rows // sub) * sub)
        nb = max(nb, sub)
    num_nb = pl.cdiv(rows, nb)

    # 2 inputs x 2 pipeline buffers x tile, plus headroom; stays under every
    # generation's physical VMEM (v7x: 64 MiB).
    tile_bytes = nb * dc * itemsize
    vmem_limit = int(min(48 << 20, max(16 << 20, 8 * tile_bytes)))

    kernel = functools.partial(_iou_kernel, d_row=d_row, dc=dc,
                               needs_mask=needs_mask)

    cost = pl.CostEstimate(
        flops=3 * rows * d_row,
        transcendentals=0,
        bytes_accessed=2 * rows * d_row * itemsize + 2 * rows * 4,
    )

    and_p, sum_p = pl.pallas_call(
        kernel,
        out_shape=(jax.ShapeDtypeStruct((rows, 1), jnp.float32),
                   jax.ShapeDtypeStruct((rows, 1), jnp.float32)),
        grid_spec=pltpu.PrefetchScalarGridSpec(
            num_scalar_prefetch=0,
            grid=(num_nb, num_dc),
            in_specs=[
                pl.BlockSpec((nb, dc), lambda i, j: (i, j)),
                pl.BlockSpec((nb, dc), lambda i, j: (i, j)),
            ],
            out_specs=[
                pl.BlockSpec((nb, 1), lambda i, j: (i, 0)),
                pl.BlockSpec((nb, 1), lambda i, j: (i, 0)),
            ],
            scratch_shapes=[
                pltpu.VMEM((nb, 1), jnp.float32),
                pltpu.VMEM((nb, 1), jnp.float32),
            ],
        ),
        compiler_params=pltpu.CompilerParams(
            dimension_semantics=("parallel", "arbitrary"),
            vmem_limit_bytes=vmem_limit,
        ),
        cost_estimate=cost,
    )(pred2, target2)

    # Finalize: re-combine the `fold` partial rows per sample and apply IoU.
    iand = and_p.reshape(n, fold).sum(axis=1)
    isum = sum_p.reshape(n, fold).sum(axis=1)
    ior = isum - iand
    iou = 1.0 - iand / (ior + 1e-8)
    if size_average:
        return jnp.mean(iou)
    return iou


def _iou_ref(pred, target, size_average=True):
    iand = jnp.sum(target * pred, axis=(1, 2, 3))
    ior = jnp.sum(target, axis=(1, 2, 3)) + jnp.sum(pred, axis=(1, 2, 3)) - iand
    iou = 1.0 - iand / (ior + 1e-8)
    return jnp.mean(iou) if size_average else iou


if __name__ == "__main__":
    key = jax.random.PRNGKey(0)
    k1, k2, k3, k4, k5, k6 = jax.random.split(key, 6)

    # Case 1: N=2, C=4, H=W=16 (D=1024). Exercises the sublane-dense fold
    # (2 rows -> 16 rows x 128 lanes), size_average=True.
    N, C, H, W = 2, 4, 16, 16
    pred = jax.nn.sigmoid(jax.random.normal(k1, (N, C, H, W), dtype=jnp.float32))
    target = (jax.random.uniform(k2, (N, C, H, W)) > 0.5).astype(jnp.float32)
    loss = jax.block_until_ready(iou_loss(pred, target))
    ref = jax.block_until_ready(_iou_ref(pred, target))
    assert jnp.allclose(loss, ref, atol=1e-5, rtol=1e-5), (loss, ref)

    # Case 2: D=300 (full-dim lane block, not a multiple of 128, no mask),
    # size_average=False (per-sample vector).
    N2, C2, H2, W2 = 3, 3, 10, 10
    pred_b = jax.nn.sigmoid(jax.random.normal(k3, (N2, C2, H2, W2), dtype=jnp.float32))
    target_b = (jax.random.uniform(k4, (N2, C2, H2, W2)) > 0.5).astype(jnp.float32)
    loss_vec = jax.block_until_ready(iou_loss(pred_b, target_b, size_average=False))
    ref_vec = jax.block_until_ready(_iou_ref(pred_b, target_b, size_average=False))
    assert jnp.allclose(loss_vec, ref_vec, atol=1e-5, rtol=1e-5), (loss_vec, ref_vec)

    # Case 3: tiny tile target forces multi-chunk D with a ragged final chunk,
    # exercising the gated-mask path and the D-reduction grid axis.
    N3, C3, H3, W3 = 4, 2, 12, 12
    pred_c = jax.nn.sigmoid(jax.random.normal(k5, (N3, C3, H3, W3), dtype=jnp.float32))
    target_c = (jax.random.uniform(k6, (N3, C3, H3, W3)) > 0.5).astype(jnp.float32)
    loss_c = jax.block_until_ready(
        iou_loss(pred_c, target_c, size_average=True, tile_target_bytes=8 * 128 * 4))
    ref_c = jax.block_until_ready(_iou_ref(pred_c, target_c))
    assert jnp.allclose(loss_c, ref_c, atol=1e-5, rtol=1e-5), (loss_c, ref_c)

    print("KERNEL_OK")
</pallas_src>

<mosaic_0001>
module attributes {stable_mosaic.version = 11 : i64} {
  func.func @_iou_kernel(%arg0: i32, %arg1: i32, %arg2: memref<16x128xf32, #tpu.memory_space<vmem>>, %arg3: memref<16x128xf32, #tpu.memory_space<vmem>>, %arg4: memref<16x1xf32, #tpu.memory_space<vmem>>, %arg5: memref<16x1xf32, #tpu.memory_space<vmem>>, %arg6: memref<16x1xf32, #tpu.memory_space<vmem>>, %arg7: memref<16x1xf32, #tpu.memory_space<vmem>>) attributes {dimension_semantics = [#tpu.dimension_semantics<parallel>, #tpu.dimension_semantics<arbitrary>], iteration_bounds = array<i64: 1, 1>, scalar_prefetch = 0 : i64, scratch_operands = 2 : i64, tpu.core_type = #tpu.core_type<tc>, window_params = [{transform_indices = @transform_0, window_bounds = array<i64: 16, 128>}, {transform_indices = @transform_1, window_bounds = array<i64: 16, 128>}, {transform_indices = @transform_2, window_bounds = array<i64: 16, 1>}, {transform_indices = @transform_3, window_bounds = array<i64: 16, 1>}]} {
    %c0_i32 = arith.constant 0 : i32
    %0 = arith.cmpi eq, %arg1, %c0_i32 : i32
    %1 = arith.extui %0 : i1 to i32
    %c0_i32_0 = arith.constant 0 : i32
    %2 = arith.cmpi ne, %1, %c0_i32_0 : i32
    scf.if %2 {
      %cst_15 = arith.constant 0.000000e+00 : f32
      %20 = vector.broadcast %cst_15 : f32 to vector<16x1xf32>
      %c0_16 = arith.constant 0 : index
      %c0_17 = arith.constant 0 : index
      %21 = vector.load %arg6[%c0_16, %c0_17] : memref<16x1xf32, #tpu.memory_space<vmem>>, vector<16x1xf32>
      tpu.vector_store %arg6[%c0_16, %c0_17], %20 {strides = array<i32>} : memref<16x1xf32, #tpu.memory_space<vmem>>, vector<16x1xf32>,
      %cst_18 = arith.constant 0.000000e+00 : f32
      %22 = vector.broadcast %cst_18 : f32 to vector<16x1xf32>
      %c0_19 = arith.constant 0 : index
      %c0_20 = arith.constant 0 : index
      %23 = vector.load %arg7[%c0_19, %c0_20] : memref<16x1xf32, #tpu.memory_space<vmem>>, vector<16x1xf32>
      tpu.vector_store %arg7[%c0_19, %c0_20], %22 {strides = array<i32>} : memref<16x1xf32, #tpu.memory_space<vmem>>, vector<16x1xf32>,
    } else {
    }
    %c0 = arith.constant 0 : index
    %c0_1 = arith.constant 0 : index
    %3 = vector.load %arg2[%c0, %c0_1] : memref<16x128xf32, #tpu.memory_space<vmem>>, vector<16x128xf32>
    %c0_2 = arith.constant 0 : index
    %c0_3 = arith.constant 0 : index
    %4 = vector.load %arg3[%c0_2, %c0_3] : memref<16x128xf32, #tpu.memory_space<vmem>>, vector<16x128xf32>
    %c0_4 = arith.constant 0 : index
    %c0_5 = arith.constant 0 : index
    %5 = vector.load %arg6[%c0_4, %c0_5] : memref<16x1xf32, #tpu.memory_space<vmem>>, vector<16x1xf32>
    %6 = arith.mulf %4, %3 : vector<16x128xf32>
    %cst = arith.constant dense<0.000000e+00> : vector<16xf32>
    %7 = vector.multi_reduction <add>, %6, %cst [1] : vector<16x128xf32> to vector<16xf32>
    %8 = vector.shape_cast %7 : vector<16xf32> to vector<16x1xf32>
    %9 = arith.addf %5, %8 : vector<16x1xf32>
    %c0_6 = arith.constant 0 : index
    %c0_7 = arith.constant 0 : index
    %10 = vector.load %arg6[%c0_6, %c0_7] : memref<16x1xf32, #tpu.memory_space<vmem>>, vector<16x1xf32>
    tpu.vector_store %arg6[%c0_6, %c0_7], %9 {strides = array<i32>} : memref<16x1xf32, #tpu.memory_space<vmem>>, vector<16x1xf32>,
    %c0_8 = arith.constant 0 : index
    %c0_9 = arith.constant 0 : index
    %11 = vector.load %arg7[%c0_8, %c0_9] : memref<16x1xf32, #tpu.memory_space<vmem>>, vector<16x1xf32>
    %12 = arith.addf %4, %3 : vector<16x128xf32>
    %cst_10 = arith.constant dense<0.000000e+00> : vector<16xf32>
    %13 = vector.multi_reduction <add>, %12, %cst_10 [1] : vector<16x128xf32> to vector<16xf32>
    %14 = vector.shape_cast %13 : vector<16xf32> to vector<16x1xf32>
    %15 = arith.addf %11, %14 : vector<16x1xf32>
    %c0_11 = arith.constant 0 : index
    %c0_12 = arith.constant 0 : index
    %16 = vector.load %arg7[%c0_11, %c0_12] : memref<16x1xf32, #tpu.memory_space<vmem>>, vector<16x1xf32>
    tpu.vector_store %arg7[%c0_11, %c0_12], %15 {strides = array<i32>} : memref<16x1xf32, #tpu.memory_space<vmem>>, vector<16x1xf32>,
    %c0_i32_13 = arith.constant 0 : i32
    %17 = arith.cmpi eq, %arg1, %c0_i32_13 : i32
    %18 = arith.extui %17 : i1 to i32
    %c0_i32_14 = arith.constant 0 : i32
    %19 = arith.cmpi ne, %18, %c0_i32_14 : i32
    scf.if %19 {
      %c0_15 = arith.constant 0 : index
      %c0_16 = arith.constant 0 : index
      %20 = vector.load %arg6[%c0_15, %c0_16] : memref<16x1xf32, #tpu.memory_space<vmem>>, vector<16x1xf32>
      %c0_17 = arith.constant 0 : index
      %c0_18 = arith.constant 0 : index
      %21 = vector.load %arg4[%c0_17, %c0_18] : memref<16x1xf32, #tpu.memory_space<vmem>>, vector<16x1xf32>
      tpu.vector_store %arg4[%c0_17, %c0_18], %20 {strides = array<i32>} : memref<16x1xf32, #tpu.memory_space<vmem>>, vector<16x1xf32>,
      %c0_19 = arith.constant 0 : index
      %c0_20 = arith.constant 0 : index
      %22 = vector.load %arg7[%c0_19, %c0_20] : memref<16x1xf32, #tpu.memory_space<vmem>>, vector<16x1xf32>
      %c0_21 = arith.constant 0 : index
      %c0_22 = arith.constant 0 : index
      %23 = vector.load %arg5[%c0_21, %c0_22] : memref<16x1xf32, #tpu.memory_space<vmem>>, vector<16x1xf32>
      tpu.vector_store %arg5[%c0_21, %c0_22], %22 {strides = array<i32>} : memref<16x1xf32, #tpu.memory_space<vmem>>, vector<16x1xf32>,
    } else {
    }
    return
  }
  func.func @transform_0(%arg0: i32, %arg1: i32) -> (i32, i32) {
    %c0_i32 = arith.constant 0 : i32
    return %arg0, %arg1 : i32, i32
  }
  func.func @transform_1(%arg0: i32, %arg1: i32) -> (i32, i32) {
    %c0_i32 = arith.constant 0 : i32
    return %arg0, %arg1 : i32, i32
  }
  func.func @transform_2(%arg0: i32, %arg1: i32) -> (i32, i32) {
    %c0_i32 = arith.constant 0 : i32
    %c0_i32_0 = arith.constant 0 : i32
    return %arg0, %c0_i32 : i32, i32
  }
  func.func @transform_3(%arg0: i32, %arg1: i32) -> (i32, i32) {
    %c0_i32 = arith.constant 0 : i32
    %c0_i32_0 = arith.constant 0 : i32
    return %arg0, %c0_i32 : i32, i32
  }
}

</mosaic_0001>

<bundles_post_ra>
// kernel: tpu_custom_call.1
= control target key start
LH: loop header
LB: loop body
LE: loop exit
PB: predicated region body
PF: predicated region fallthrough
CT: control target
= control target key end

     0   :  { %9 = vsyncpa [#allocation5], 0  ;;  %s226_s0 = inlined_call_operand.hbm [shape: f32[16,128], index: 0, kind: input, shape index: {}]   ;;  %s227_s1 = inlined_call_operand.hbm [shape: f32[16,128], index: 1, kind: input, shape index: {}]   ;;  %s228_s2 = inlined_call_operand.vmem [shape: f32[16,1], index: 2, kind: output, shape index: {0}]   ;;  %s229_s3 = inlined_call_operand.vmem [shape: f32[16,1], index: 3, kind: output, shape index: {1}]  }
   0x1   :  { %10 = vsyncpa [#allocation7], 0  ;;  %s153_s12 = smov [#allocation4]   ;;  %s105_s16 = scalar_lea.hbm %s226_s0, 256 }
   0x2   :  { %s16_s13 = sshll.u32 %s153_s12, 4  ;;  %p106_p0 = scmp.ne.s32.totalorder %s226_s0, %s105_s16  ;;  %s17_s13 = int_to_ptr.vmem [resolvable:$true] %s16_s13 }
   0x3   :  { %p109_p1 = scmp.lt.u32.totalorder %s105_s16, %s226_s0 }
   0x5   :  { %p111_p2 = pnand %p109_p1, %p106_p0 }
   0x7   :  { %114 = shalt.err (!%p111_p2)
}
   0x8   :  { %s115_s21 = scalar_lea.vmem %s17_s13, 256  ;;  %p120_p4 = scmp.lt.s32.totalorder %s17_s13, %s17_s13 }
   0x9   :  { %p116_p3 = scmp.ne.s32.totalorder %s17_s13, %s115_s21  ;;  %p121_p5 = scmp.lt.s32.totalorder %s115_s21, %s115_s21 }
   0xb   :  { %p122_p6 = por %p121_p5, %p120_p4 }
   0xd   :  { %p123_p7 = pnand %p122_p6, %p116_p3 }
   0xf   :  { %126 = shalt.err (!%p123_p7)
}
  0x10   :  { %s154_s22 = smov 128   ;;  %s155_s23 = smov 8  }
  0x11   :  { %22 = dma.hbm_to_vmem [thread:$0]  %s226_s0, 256, %s17_s13, [#allocation5], %s154_s22, %s154_s22, %s155_s23  }
  0x12   :  { %s156_s26 = smov [#allocation6]   ;;  %s127_s30 = scalar_lea.hbm %s227_s1, 256 }
  0x13   :  { %s28_s27 = sshll.u32 %s156_s26, 4  ;;  %p128_p8 = scmp.ne.s32.totalorder %s227_s1, %s127_s30  ;;  %s29_s27 = int_to_ptr.vmem [resolvable:$true] %s28_s27 }
  0x14   :  { %p131_p9 = scmp.lt.u32.totalorder %s127_s30, %s227_s1 }
  0x16   :  { %p133_p10 = pnand %p131_p9, %p128_p8 }
  0x18   :  { %136 = shalt.err (!%p133_p10)
}
  0x19   :  { %s137_s8 = scalar_lea.vmem %s29_s27, 256  ;;  %p142_p12 = scmp.lt.s32.totalorder %s29_s27, %s29_s27 }
  0x1a   :  { %p138_p11 = scmp.ne.s32.totalorder %s29_s27, %s137_s8  ;;  %p143_p13 = scmp.lt.s32.totalorder %s137_s8, %s137_s8 }
  0x1c   :  { %p144_p0 = por %p143_p13, %p142_p12 }
  0x1e   :  { %p145_p1 = pnand %p144_p0, %p138_p11 }
  0x20   :  { %148 = shalt.err (!%p145_p1)
}
  0x21   :  { %34 = dma.hbm_to_vmem [thread:$0]  %s227_s1, 256, %s29_s27, [#allocation7], %s154_s22, %s154_s22, %s155_s23  }
  0x22   :  { %149 = dma.done.wait [#allocation5], 256  }
  0x23   :  { %150 = vsyncadd [#allocation5], 4294967040 }
  0x24   :  { %151 = dma.done.wait [#allocation7], 256  }
  0x25   :  { %152 = vsyncadd [#allocation7], 4294967040  ;;  %vm45_vm0 = vcmask 7168   ;;  %v157_v0 = vmov 0.0   ;;  %v50_v1 = vld [vmem:[#allocation4] sm:$0xff]  ;;  %v52_v2 = vld [vmem:[#allocation6] sm:$0xff] }
  0x26   :  { %48 = vst.msk [vmem:[#allocation3] sm:$0xff] %vm45_vm0, %v157_v0  ;;  %46 = vst.msk [vmem:[#allocation2] sm:$0xff] %vm45_vm0, %v157_v0  ;;  %v51_v3 = vld [vmem:[#allocation4 + $0x8] sm:$0xff]  ;;  %v69_v4 = vadd.f32 %v52_v2, %v50_v1  ;;  %v56_v5 = vmul.f32 %v52_v2, %v50_v1  ;;  %v53_v6 = vld [vmem:[#allocation6 + $0x8] sm:$0xff] }
  0x27   :  { %47 = vst.msk [vmem:[#allocation2 + $0x8] sm:$0xff] %vm45_vm0, %v157_v0  ;;  %49 = vst.msk [vmem:[#allocation3 + $0x8] sm:$0xff] %vm45_vm0, %v157_v0  ;;  %v70_v7 = vadd.f32 %v53_v6, %v51_v3  ;;  %v57_v8 = vmul.f32 %v53_v6, %v51_v3 }
  0x28   :  { %71 = vadd.xlane.f32.xlu1 %v69_v4  ;;  %58 = vadd.xlane.f32.xlu0 %v56_v5 }
  0x2c   :  { %73 = vadd.xlane.f32.xlu1 %v70_v7  ;;  %60 = vadd.xlane.f32.xlu0 %v57_v8 }
  0x2d   :  { %v67_v9 = vld [vmem:[#allocation3] sm:$0xff]  ;;  %v54_v10 = vld [vmem:[#allocation2] sm:$0xff] }
  0x2e   :  { %v68_v15 = vld [vmem:[#allocation3 + $0x8] sm:$0xff]  ;;  %v55_v16 = vld [vmem:[#allocation2 + $0x8] sm:$0xff] }
  0xb5   :  { %v72_v11 = vpop.xlane.xlu1 %71  ;;  %v59_v12 = vpop.xlane.xlu0 %58 }
  0xb6   :  { %v75_v13 = vadd.f32 %v72_v11, %v67_v9  ;;  %v62_v14 = vadd.f32 %v59_v12, %v54_v10 }
  0xb8   :  { %77 = vst.msk [vmem:[#allocation3] sm:$0xff] %vm45_vm0, %v75_v13  ;;  %65 = vst.msk [vmem:[#allocation2] sm:$0xff] %vm45_vm0, %v62_v14 }
  0xb9   :  { %v74_v17 = vpop.xlane.xlu1 %73  ;;  %v61_v18 = vpop.xlane.xlu0 %60 }
  0xba   :  { %v76_v19 = vadd.f32 %v74_v17, %v68_v15  ;;  %v63_v20 = vadd.f32 %v61_v18, %v55_v16 }
  0xbc   :  { %78 = vst.msk [vmem:[#allocation3 + $0x8] sm:$0xff] %vm45_vm0, %v76_v19  ;;  %66 = vst.msk [vmem:[#allocation2 + $0x8] sm:$0xff] %vm45_vm0, %v63_v20 }
  0xbf   :  { %v86_v21 = vld [vmem:[#allocation3] sm:$0xff]  ;;  %v82_v22 = vld [vmem:[#allocation2] sm:$0xff] }
  0xc0   :  { %88 = vst.msk [vmem:[%s229_s3] sm:$0xff] %vm45_vm0, %v86_v21  ;;  %84 = vst.msk [vmem:[%s228_s2] sm:$0xff] %vm45_vm0, %v82_v22 }
  0xc3   :  { %v87_v23 = vld [vmem:[#allocation3 + $0x8] sm:$0xff]  ;;  %v83_v24 = vld [vmem:[#allocation2 + $0x8] sm:$0xff] }
  0xc4   :  { %89 = vst.msk [vmem:[%s229_s3 + $0x8] sm:$0xff] %vm45_vm0, %v87_v23  ;;  %85 = vst.msk [vmem:[%s228_s2 + $0x8] sm:$0xff] %vm45_vm0, %v83_v24 }
  0xc5   :  { %98 = vsyncpa [#allocation5], 1 }
  0xc6   :  { %99 = vsyncpa [#allocation7], 1 }

</bundles_post_ra>
